<compile_context>
chip_gen: v7x
topology: tpu7x:2x2x1
jax: 0.10.0
libtpu: 0.0.40
codegen_flags: <defaults>
</compile_context>

<pallas_src>
import math
import numpy as np
import jax
import jax.numpy as jnp
from jax import lax
from jax.experimental import pallas as pl
from jax.experimental.pallas import tpu as pltpu

_HIGHEST = jax.lax.Precision.HIGHEST


# --------------------------------------------------------------------------- #
# Kernel
# --------------------------------------------------------------------------- #
def _gps_kernel(x_ref, wr_ref, br_ref, w1_ref, b1_ref, w2_ref, b2_ref, o_ref):
    """One row-tile of the GPS forward pass.

    x_ref  : (tm, 8)   raw points, feature dim zero-padded 3 -> 8
    wr_ref : (8, P)    folded random-feature weights ([wr_eff, wr_eff]; rows 3..7 = 0)
    br_ref : (1, P)    folded bias ([-c*s @ Wr^T, -c*s @ Wr^T + pi/2])
    w1_ref : (P, H)    factor * W1^T      b1_ref: (1, H)
    w2_ref : (H, O)    b2_ref: (1, O)
    o_ref  : (tm, O)
    """
    # K=8 input projection on the MXU (the MXU has slack here; the VPU does not).
    h = jnp.dot(x_ref[...], wr_ref[...], precision=_HIGHEST,
                preferred_element_type=jnp.float32) + br_ref[...]        # (tm, P)

    # Single width-P sine (the concat is folded into wr/br constants).
    s = jnp.sin(h)

    z1 = jnp.dot(s, w1_ref[...], precision=_HIGHEST,
                 preferred_element_type=jnp.float32) + b1_ref[...]       # (tm, H)

    # exact (erf) GELU -- matches torch.nn.functional.gelu default.
    # (tanh approximation would move work VPU->EUP but changes numerics; not
    #  taken without accuracy sign-off.)
    g = 0.5 * z1 * (1.0 + lax.erf(z1 * (1.0 / math.sqrt(2.0))))

    z2 = jnp.dot(g, w2_ref[...], precision=_HIGHEST,
                 preferred_element_type=jnp.float32) + b2_ref[...]       # (tm, O)
    o_ref[...] = z2.astype(o_ref.dtype)


# --------------------------------------------------------------------------- #
# Hardware queries (best-effort; safe fallbacks)
# --------------------------------------------------------------------------- #
def _num_tensorcores():
    try:
        info = pltpu.get_tpu_info()
    except Exception:
        return 1
    for attr in ("num_cores", "core_count", "cores_per_chip",
                 "tensorcores_per_chip", "num_tensorcores"):
        v = getattr(info, attr, None)
        if isinstance(v, int) and v > 0:
            return v
    return 1


def _vmem_capacity_bytes():
    try:
        info = pltpu.get_tpu_info()
        v = getattr(info, "vmem_capacity_bytes", None)
        if isinstance(v, int) and v > 0:
            return v
    except Exception:
        pass
    return 64 << 20  # conservative default (v7x per-TC)


def _round_up(a, b):
    return ((a + b - 1) // b) * b


def _vmem_bytes_estimate(tm, p, h, o):
    """Rough per-step VMEM footprint (double-buffered I/O + weights + live f32)."""
    dbl = 2
    weights = (8 * p + p + p * h + h + h * o + o) * 4 * dbl
    io = (tm * 8 + tm * o) * 4 * dbl
    live = tm * (p + h + o) * 4
    return weights + io + live


# --------------------------------------------------------------------------- #
# One-time parameter preprocessing (constant folding, hoisted out of forward)
# --------------------------------------------------------------------------- #
def prepare_params(params):
    """Fold normalization, the sin/cos concat and the 1/sqrt(P) factor into
    constants.  Call once; pass the result to gps_forward."""
    center = jnp.asarray(params["center"], jnp.float32).reshape(1, 3)
    extent = jnp.asarray(params["extent"], jnp.float32).reshape(1, 3)   # maxi - mini
    wr_t = jnp.asarray(params["wr_t"], jnp.float32)                      # (3, P/2)
    w1_t = jnp.asarray(params["w1_t"], jnp.float32)                      # (P, H)
    b1 = jnp.asarray(params["b1"], jnp.float32).reshape(1, -1)           # (1, H)
    w2_t = jnp.asarray(params["w2_t"], jnp.float32)                      # (H, O)
    b2 = jnp.asarray(params["b2"], jnp.float32).reshape(1, -1)           # (1, O)
    factor = jnp.float32(params["factor"])

    p_half = wr_t.shape[1]
    assert w1_t.shape[0] == 2 * p_half
    p_dim = 2 * p_half

    scale = 1.0 / extent
    # ((inp - center)*scale) @ Wr^T == inp @ (scale^T * Wr^T) - (center*scale) @ Wr^T
    wr_eff = scale.reshape(3, 1) * wr_t                                  # (3, P/2)
    br = -jnp.dot(center * scale, wr_t, precision=_HIGHEST)              # (1, P/2)

    # sin(cat([h, h+pi/2])) * f @ W1^T == sin(h_cat) @ (f*W1^T),
    # with h_cat = inp @ [wr_eff, wr_eff] + [br, br + pi/2].
    wr_cat = jnp.concatenate([wr_eff, wr_eff], axis=1)                   # (3, P)
    wr_pad = jnp.zeros((8, p_dim), jnp.float32).at[:3].set(wr_cat)       # K padded to 8
    br_cat = jnp.concatenate([br, br + np.pi / 2], axis=1)               # (1, P)
    w1_cat = factor * w1_t                                               # (P, H)

    return {
        "wr": wr_pad, "br": br_cat, "w1": w1_cat, "b1": b1,
        "w2": w2_t, "b2": b2,
        "p": int(p_dim), "h": int(w1_t.shape[1]), "o": int(w2_t.shape[1]),
    }


# --------------------------------------------------------------------------- #
# Forward wrapper
# --------------------------------------------------------------------------- #
def gps_forward(inp, params, *, tm=4096):
    """GPSBaseModel.forward.  inp: (..., 3) float32 -> (..., output_dim) float32."""
    if "wr" not in params:            # accept raw params too
        params = prepare_params(params)

    p_dim, hdim, odim = params["p"], params["h"], params["o"]

    lead = inp.shape[:-1]
    xf = inp.reshape(-1, 3).astype(jnp.float32)
    n = xf.shape[0]

    vmem_cap = _vmem_capacity_bytes()
    budget = max((vmem_cap * 3) // 4, 32 << 20)

    # Row tile: sublane-aligned, caller-shape agnostic (we pad), capped by the
    # VMEM budget, and split across TensorCores only on multi-TC parts.
    n_al = _round_up(max(n, 1), 8)
    tm_eff = min(_round_up(tm, 8), n_al)
    while tm_eff > 512 and _vmem_bytes_estimate(tm_eff, p_dim, hdim, odim) > budget:
        tm_eff = _round_up(tm_eff // 2, 8)

    num_tc = _num_tensorcores()
    if num_tc > 1 and tm_eff >= n_al and n_al >= num_tc * 1024:
        tm_eff = _round_up((n_al + num_tc - 1) // num_tc, 8)   # balanced tiles per TC

    n_pad = _round_up(n_al, tm_eff)
    # Pad rows (to tile multiple) and the feature dim 3 -> 8 (zeros; matches the
    # zero-padded rows of wr).
    xf = jnp.pad(xf, ((0, n_pad - n), (0, 5)))
    grid = n_pad // tm_eff

    out = pl.pallas_call(
        _gps_kernel,
        out_shape=jax.ShapeDtypeStruct((n_pad, odim), jnp.float32),
        grid_spec=pltpu.PrefetchScalarGridSpec(
            num_scalar_prefetch=0,
            grid=(grid,),
            in_specs=[
                pl.BlockSpec((tm_eff, 8), lambda i: (i, 0)),       # points
                pl.BlockSpec((8, p_dim), lambda i: (0, 0)),        # wr (folded)
                pl.BlockSpec((1, p_dim), lambda i: (0, 0)),        # br (folded)
                pl.BlockSpec((p_dim, hdim), lambda i: (0, 0)),     # w1 (folded)
                pl.BlockSpec((1, hdim), lambda i: (0, 0)),         # b1
                pl.BlockSpec((hdim, odim), lambda i: (0, 0)),      # w2
                pl.BlockSpec((1, odim), lambda i: (0, 0)),         # b2
            ],
            out_specs=pl.BlockSpec((tm_eff, odim), lambda i: (i, 0)),
        ),
        compiler_params=pltpu.CompilerParams(
            dimension_semantics=("parallel",),
            vmem_limit_bytes=int(budget)),
    )(xf, params["wr"], params["br"], params["w1"], params["b1"],
      params["w2"], params["b2"])

    return out[:n].reshape(*lead, odim)


# --------------------------------------------------------------------------- #
# Synthetic parameters + pure-JAX reference
# --------------------------------------------------------------------------- #
def make_params(key, pos_enc_dim=64, hidden_dim=128, output_dim=128, n_nodes=64):
    """Deterministic synthetic parameters mirroring GPSBaseModel.__init__ shapes."""
    ks = jax.random.split(key, 6)

    # TODO(synk): real model loads canonical_nodes3.npy from disk; synthesized here.
    nodes = jax.random.uniform(ks[0], (n_nodes, 3), minval=-1.0, maxval=1.0)
    mini = jnp.min(nodes, axis=0)
    maxi = jnp.max(nodes, axis=0)
    center = (mini + maxi) / 2.0

    p_half = pos_enc_dim // 2
    # W_r: nn.Linear(3, P/2, bias=False), init normal std=12; stored transposed.
    wr_t = 12.0 * jax.random.normal(ks[1], (3, p_half), dtype=jnp.float32)

    lim1 = 1.0 / math.sqrt(pos_enc_dim)
    w1_t = jax.random.uniform(ks[2], (pos_enc_dim, hidden_dim),
                              minval=-lim1, maxval=lim1, dtype=jnp.float32)
    b1 = jax.random.uniform(ks[3], (hidden_dim,),
                            minval=-lim1, maxval=lim1, dtype=jnp.float32)

    lim2 = 1.0 / math.sqrt(hidden_dim)
    w2_t = jax.random.uniform(ks[4], (hidden_dim, output_dim),
                              minval=-lim2, maxval=lim2, dtype=jnp.float32)
    b2 = jax.random.uniform(ks[5], (output_dim,),
                            minval=-lim2, maxval=lim2, dtype=jnp.float32)

    return {
        "center": center.astype(jnp.float32),
        "extent": (maxi - mini).astype(jnp.float32),
        "wr_t": wr_t,
        "w1_t": w1_t,
        "b1": b1,
        "w2_t": w2_t,
        "b2": b2,
        "factor": float(1.0 / np.sqrt(np.float32(pos_enc_dim))),
    }


def _ref_forward(inp, params):
    """Pure-JAX faithful reproduction of the original PyTorch forward
    (per-dot HIGHEST precision to match f32 torch numerics; no global config)."""
    x = (inp - params["center"]) / params["extent"]
    x = jnp.dot(x, params["wr_t"], precision=_HIGHEST)
    x = jnp.sin(jnp.concatenate([x, x + np.pi / 2], axis=-1)) * params["factor"]
    x = jax.nn.gelu(jnp.dot(x, params["w1_t"], precision=_HIGHEST) + params["b1"],
                    approximate=False)
    return jnp.dot(x, params["w2_t"], precision=_HIGHEST) + params["b2"]


if __name__ == "__main__":
    key = jax.random.PRNGKey(0)
    kp, kx, kx2 = jax.random.split(key, 3)

    pos_enc_dim, hidden_dim, output_dim = 64, 128, 128
    raw_params = make_params(kp, pos_enc_dim, hidden_dim, output_dim)
    params = prepare_params(raw_params)       # one-time derived-constant build

    # small input: batch=2, seq=8 points in 3-D
    x = jax.random.normal(kx, (2, 8, 3), dtype=jnp.float32)
    out = jax.block_until_ready(gps_forward(x, params))
    ref = _ref_forward(x, raw_params)
    np.testing.assert_allclose(np.asarray(out), np.asarray(ref),
                               rtol=1e-4, atol=1e-4)
    assert out.shape == (2, 8, output_dim)

    # ragged row count (exercises padding / non-divisible tiles)
    x2 = jax.random.normal(kx2, (3, 7, 3), dtype=jnp.float32)
    out2 = jax.block_until_ready(gps_forward(x2, params))
    ref2 = _ref_forward(x2, raw_params)
    np.testing.assert_allclose(np.asarray(out2), np.asarray(ref2),
                               rtol=1e-4, atol=1e-4)
    assert out2.shape == (3, 7, output_dim)

    print("KERNEL_OK")
</pallas_src>

<mosaic_0001>
module attributes {stable_mosaic.version = 11 : i64} {
  func.func @_gps_kernel(%arg0: i32, %arg1: memref<16x8xf32, #tpu.memory_space<vmem>>, %arg2: memref<8x64xf32, #tpu.memory_space<vmem>>, %arg3: memref<1x64xf32, #tpu.memory_space<vmem>>, %arg4: memref<64x128xf32, #tpu.memory_space<vmem>>, %arg5: memref<1x128xf32, #tpu.memory_space<vmem>>, %arg6: memref<128x128xf32, #tpu.memory_space<vmem>>, %arg7: memref<1x128xf32, #tpu.memory_space<vmem>>, %arg8: memref<16x128xf32, #tpu.memory_space<vmem>>) attributes {dimension_semantics = [#tpu.dimension_semantics<parallel>], iteration_bounds = array<i64: 1>, scalar_prefetch = 0 : i64, scratch_operands = 0 : i64, tpu.core_type = #tpu.core_type<tc>, window_params = [{transform_indices = @transform_0, window_bounds = array<i64: 16, 8>}, {pipeline_mode = #tpu.pipeline_mode<synchronous>, transform_indices = @transform_1, window_bounds = array<i64: 8, 64>}, {pipeline_mode = #tpu.pipeline_mode<synchronous>, transform_indices = @transform_2, window_bounds = array<i64: 1, 64>}, {pipeline_mode = #tpu.pipeline_mode<synchronous>, transform_indices = @transform_3, window_bounds = array<i64: 64, 128>}, {pipeline_mode = #tpu.pipeline_mode<synchronous>, transform_indices = @transform_4, window_bounds = array<i64: 1, 128>}, {pipeline_mode = #tpu.pipeline_mode<synchronous>, transform_indices = @transform_5, window_bounds = array<i64: 128, 128>}, {pipeline_mode = #tpu.pipeline_mode<synchronous>, transform_indices = @transform_6, window_bounds = array<i64: 1, 128>}, {transform_indices = @transform_7, window_bounds = array<i64: 16, 128>}]} {
    %c0 = arith.constant 0 : index
    %c0_0 = arith.constant 0 : index
    %0 = vector.load %arg1[%c0, %c0_0] : memref<16x8xf32, #tpu.memory_space<vmem>>, vector<16x8xf32>
    %c0_1 = arith.constant 0 : index
    %c0_2 = arith.constant 0 : index
    %1 = vector.load %arg2[%c0_1, %c0_2] : memref<8x64xf32, #tpu.memory_space<vmem>>, vector<8x64xf32>
    %cst = arith.constant dense<0.000000e+00> : vector<16x64xf32>
    %2 = tpu.matmul %0, %1, %cst {dimension_numbers = #tpu.dot_dimension_numbers<[1], [0], [0], [1], [0, 0, 1, 1], [], []>, precision = #tpu.contract_precision<fp32>} : vector<16x8xf32>, vector<8x64xf32>, vector<16x64xf32> -> vector<16x64xf32>
    %c0_3 = arith.constant 0 : index
    %c0_4 = arith.constant 0 : index
    %3 = vector.load %arg3[%c0_3, %c0_4] : memref<1x64xf32, #tpu.memory_space<vmem>>, vector<1x64xf32>
    %4 = vector.broadcast %3 : vector<1x64xf32> to vector<16x64xf32>
    %5 = arith.addf %2, %4 : vector<16x64xf32>
    %6 = math.sin %5 : vector<16x64xf32>
    %c0_5 = arith.constant 0 : index
    %c0_6 = arith.constant 0 : index
    %7 = vector.load %arg4[%c0_5, %c0_6] : memref<64x128xf32, #tpu.memory_space<vmem>>, vector<64x128xf32>
    %cst_7 = arith.constant dense<0.000000e+00> : vector<16x128xf32>
    %8 = tpu.matmul %6, %7, %cst_7 {dimension_numbers = #tpu.dot_dimension_numbers<[1], [0], [0], [1], [0, 0, 1, 1], [], []>, precision = #tpu.contract_precision<fp32>} : vector<16x64xf32>, vector<64x128xf32>, vector<16x128xf32> -> vector<16x128xf32>
    %c0_8 = arith.constant 0 : index
    %c0_9 = arith.constant 0 : index
    %9 = vector.load %arg5[%c0_8, %c0_9] : memref<1x128xf32, #tpu.memory_space<vmem>>, vector<1x128xf32>
    %10 = vector.broadcast %9 : vector<1x128xf32> to vector<16x128xf32>
    %11 = arith.addf %8, %10 : vector<16x128xf32>
    %cst_10 = arith.constant 5.000000e-01 : f32
    %12 = vector.broadcast %cst_10 : f32 to vector<16x128xf32>
    %13 = arith.mulf %12, %11 : vector<16x128xf32>
    %cst_11 = arith.constant 0.707106769 : f32
    %14 = vector.broadcast %cst_11 : f32 to vector<16x128xf32>
    %15 = arith.mulf %11, %14 : vector<16x128xf32>
    %16 = math.erf %15 : vector<16x128xf32>
    %cst_12 = arith.constant 1.000000e+00 : f32
    %17 = vector.broadcast %cst_12 : f32 to vector<16x128xf32>
    %18 = arith.addf %17, %16 : vector<16x128xf32>
    %19 = arith.mulf %13, %18 : vector<16x128xf32>
    %c0_13 = arith.constant 0 : index
    %c0_14 = arith.constant 0 : index
    %20 = vector.load %arg6[%c0_13, %c0_14] : memref<128x128xf32, #tpu.memory_space<vmem>>, vector<128x128xf32>
    %cst_15 = arith.constant dense<0.000000e+00> : vector<16x128xf32>
    %21 = tpu.matmul %19, %20, %cst_15 {dimension_numbers = #tpu.dot_dimension_numbers<[1], [0], [0], [1], [0, 0, 1, 1], [], []>, precision = #tpu.contract_precision<fp32>} : vector<16x128xf32>, vector<128x128xf32>, vector<16x128xf32> -> vector<16x128xf32>
    %c0_16 = arith.constant 0 : index
    %c0_17 = arith.constant 0 : index
    %22 = vector.load %arg7[%c0_16, %c0_17] : memref<1x128xf32, #tpu.memory_space<vmem>>, vector<1x128xf32>
    %23 = vector.broadcast %22 : vector<1x128xf32> to vector<16x128xf32>
    %24 = arith.addf %21, %23 : vector<16x128xf32>
    %c0_18 = arith.constant 0 : index
    %c0_19 = arith.constant 0 : index
    %25 = vector.load %arg8[%c0_18, %c0_19] : memref<16x128xf32, #tpu.memory_space<vmem>>, vector<16x128xf32>
    tpu.vector_store %arg8[%c0_18, %c0_19], %24 {strides = array<i32>} : memref<16x128xf32, #tpu.memory_space<vmem>>, vector<16x128xf32>,
    return
  }
  func.func @transform_0(%arg0: i32) -> (i32, i32) {
    %c0_i32 = arith.constant 0 : i32
    %c0_i32_0 = arith.constant 0 : i32
    return %arg0, %c0_i32 : i32, i32
  }
  func.func @transform_1(%arg0: i32) -> (i32, i32) {
    %c0_i32 = arith.constant 0 : i32
    %c0_i32_0 = arith.constant 0 : i32
    %c0_i32_1 = arith.constant 0 : i32
    return %c0_i32, %c0_i32_0 : i32, i32
  }
  func.func @transform_2(%arg0: i32) -> (i32, i32) {
    %c0_i32 = arith.constant 0 : i32
    %c0_i32_0 = arith.constant 0 : i32
    %c0_i32_1 = arith.constant 0 : i32
    return %c0_i32, %c0_i32_0 : i32, i32
  }
  func.func @transform_3(%arg0: i32) -> (i32, i32) {
    %c0_i32 = arith.constant 0 : i32
    %c0_i32_0 = arith.constant 0 : i32
    %c0_i32_1 = arith.constant 0 : i32
    return %c0_i32, %c0_i32_0 : i32, i32
  }
  func.func @transform_4(%arg0: i32) -> (i32, i32) {
    %c0_i32 = arith.constant 0 : i32
    %c0_i32_0 = arith.constant 0 : i32
    %c0_i32_1 = arith.constant 0 : i32
    return %c0_i32, %c0_i32_0 : i32, i32
  }
  func.func @transform_5(%arg0: i32) -> (i32, i32) {
    %c0_i32 = arith.constant 0 : i32
    %c0_i32_0 = arith.constant 0 : i32
    %c0_i32_1 = arith.constant 0 : i32
    return %c0_i32, %c0_i32_0 : i32, i32
  }
  func.func @transform_6(%arg0: i32) -> (i32, i32) {
    %c0_i32 = arith.constant 0 : i32
    %c0_i32_0 = arith.constant 0 : i32
    %c0_i32_1 = arith.constant 0 : i32
    return %c0_i32, %c0_i32_0 : i32, i32
  }
  func.func @transform_7(%arg0: i32) -> (i32, i32) {
    %c0_i32 = arith.constant 0 : i32
    %c0_i32_0 = arith.constant 0 : i32
    return %arg0, %c0_i32 : i32, i32
  }
}

</mosaic_0001>

<bundles_post_ra>
// kernel: tpu_custom_call.1
= control target key start
LH: loop header
LB: loop body
LE: loop exit
PB: predicated region body
PF: predicated region fallthrough
CT: control target
= control target key end

     0   :  { %12 = vsyncpa [#allocation3], 0  ;;  %s3663_s0 = inlined_call_operand.vmem [shape: f32[16,8], index: 0, kind: input, shape index: {}]   ;;  %s3664_s1 = inlined_call_operand.vmem [shape: f32[8,64], index: 1, kind: input, shape index: {}]   ;;  %s3665_s2 = inlined_call_operand.vmem [shape: f32[1,64], index: 2, kind: input, shape index: {}]   ;;  %s3666_s3 = inlined_call_operand.hbm [shape: f32[64,128], index: 3, kind: input, shape index: {}]   ;;  %s3667_s4 = inlined_call_operand.vmem [shape: f32[1,128], index: 4, kind: input, shape index: {}]   ;;  %s3668_s5 = inlined_call_operand.hbm [shape: f32[128,128], index: 5, kind: input, shape index: {}]   ;;  %s3669_s6 = inlined_call_operand.vmem [shape: f32[1,128], index: 6, kind: input, shape index: {}]   ;;  %s3670_s7 = inlined_call_operand.hbm [shape: f32[16,128], index: 7, kind: output, shape index: {}]  }
   0x1   :  { %13 = vsyncpa [#allocation6], 0 }
   0x2   :  { %14 = vsyncpa [#allocation4], 0  ;;  %s3086_s24 = smov [#allocation2]   ;;  %s3014_s28 = scalar_lea.hbm %s3666_s3, 1024 }
   0x3   :  { %s26_s25 = sshll.u32 %s3086_s24, 4  ;;  %p3015_p0 = scmp.ne.s32.totalorder %s3666_s3, %s3014_s28  ;;  %s27_s25 = int_to_ptr.vmem [resolvable:$true] %s26_s25 }
   0x4   :  { %p3018_p1 = scmp.lt.u32.totalorder %s3014_s28, %s3666_s3 }
   0x6   :  { %p3020_p2 = pnand %p3018_p1, %p3015_p0 }
   0x8   :  { %3023 = shalt.err (!%p3020_p2)
}
   0x9   :  { %s3024_s10 = scalar_lea.vmem %s27_s25, 1024  ;;  %p3029_p4 = scmp.lt.s32.totalorder %s27_s25, %s27_s25 }
   0xa   :  { %p3025_p3 = scmp.ne.s32.totalorder %s27_s25, %s3024_s10  ;;  %p3030_p5 = scmp.lt.s32.totalorder %s3024_s10, %s3024_s10 }
   0xc   :  { %p3031_p6 = por %p3030_p5, %p3029_p4 }
   0xe   :  { %p3032_p7 = pnand %p3031_p6, %p3025_p3 }
  0x10   :  { %3035 = shalt.err (!%p3032_p7)
}
  0x11   :  { %s3087_s11 = smov 128   ;;  %s3088_s12 = smov 8  }
  0x12   :  { %32 = dma.hbm_to_vmem [thread:$0]  %s3666_s3, 1024, %s27_s25, [#allocation3], %s3087_s11, %s3087_s11, %s3088_s12  }
  0x13   :  { %s3089_s15 = smov [#allocation5]   ;;  %s3036_s19 = scalar_lea.hbm %s3668_s5, 2048 }
  0x14   :  { %s40_s16 = sshll.u32 %s3089_s15, 4  ;;  %p3037_p8 = scmp.ne.s32.totalorder %s3668_s5, %s3036_s19  ;;  %s41_s16 = int_to_ptr.vmem [resolvable:$true] %s40_s16 }
  0x15   :  { %p3040_p9 = scmp.lt.u32.totalorder %s3036_s19, %s3668_s5 }
  0x17   :  { %p3042_p10 = pnand %p3040_p9, %p3037_p8 }
  0x19   :  { %3045 = shalt.err (!%p3042_p10)
}
  0x1a   :  { %s3046_s24 = scalar_lea.vmem %s41_s16, 2048  ;;  %p3051_p12 = scmp.lt.s32.totalorder %s41_s16, %s41_s16 }
  0x1b   :  { %p3047_p11 = scmp.ne.s32.totalorder %s41_s16, %s3046_s24  ;;  %p3052_p13 = scmp.lt.s32.totalorder %s3046_s24, %s3046_s24 }
  0x1d   :  { %p3053_p0 = por %p3052_p13, %p3051_p12 }
  0x1f   :  { %p3054_p1 = pnand %p3053_p0, %p3047_p11 }
  0x21   :  { %3057 = shalt.err (!%p3054_p1)
}
  0x22   :  { %46 = dma.hbm_to_vmem [thread:$0]  %s3668_s5, 2048, %s41_s16, [#allocation6], %s3087_s11, %s3087_s11, %s3088_s12  }
  0x23   :  { %3080 = dma.done.wait [#allocation3], 1024  }
  0x24   :  { %3081 = vsyncadd [#allocation3], 4294966272 }
  0x25   :  { %3082 = dma.done.wait [#allocation6], 2048  }
  0x26   :  { %3083 = vsyncadd [#allocation6], 4294965248  ;;  %vm65_vm0 = vcmask 64512   ;;  %v57_v0 = vld [vmem:[%s3664_s1] sm:$0xff]  ;;  %v56_v2 = vld [vmem:[%s3663_s0 + $0x8] sm:$0xff]  ;;  %s3096_s10 = smov [#allocation7]  }
  0x27   :  { %v55_v1 = vld [vmem:[%s3663_s0] sm:$0xff]  ;;  %v73_v3 = vand.u32 4294901760, %v57_v0  ;;  %v70_v5 = vsel %vm65_vm0, %v56_v2, 0  ;;  %v770_v21 = vld [vmem:[#allocation2 + $0x8] sm:$0xff]  ;;  %v771_v22 = vld [vmem:[#allocation2 + $0x10] sm:$0xff]  ;;  %s2095_s13 = sshll.u32 %s3096_s10, 4  ;;  %s2096_s13 = int_to_ptr.vmem [resolvable:$true] %s2095_s13 }
  0x28   :  { %v67_v4 = vsel %vm65_vm0, %v55_v1, 0  ;;  %v148_v7 = vand.u32 4294901760, %v70_v5  ;;  %v769_v20 = vld [vmem:[#allocation2] sm:$0xff]  ;;  %v795_v24 = vand.u32 4294901760, %v770_v21  ;;  %v772_v25 = vld [vmem:[#allocation2 + $0x18] sm:$0xff]  ;;  %v798_v26 = vand.u32 4294901760, %v771_v22  ;;  %p3063_p3 = scmp.lt.s32.totalorder %s2096_s13, %s2096_s13 }
  0x29   :  { %v138_v6 = vand.u32 4294901760, %v67_v4  ;;  %2305 = vmatprep.subr.mxu0 %v73_v3  ;;  %v160_v8 = vsub.f32 %v57_v0, %v73_v3  ;;  %v792_v23 = vand.u32 4294901760, %v769_v20  ;;  %v773_v27 = vld [vmem:[#allocation2 + $0x20] sm:$0xff]  ;;  %v774_v28 = vld [vmem:[#allocation2 + $0x28] sm:$0xff]  ;;  %v801_v29 = vand.u32 4294901760, %v772_v25  ;;  %v775_v34 = vld [vmem:[#allocation2 + $0x30] sm:$0xff] }
  0x2a   :  { %2306 = vmatpush3.msra.mxu0 %v73_v3  ;;  %v149_v10 = vsub.f32 %v70_v5, %v148_v7  ;;  %v804_v31 = vand.u32 4294901760, %v773_v27  ;;  %v807_v32 = vand.u32 4294901760, %v774_v28  ;;  %v776_v35 = vld [vmem:[#allocation2 + $0x38] sm:$0xff]  ;;  %v810_v37 = vand.u32 4294901760, %v775_v34  ;;  %s3058_s14 = scalar_lea.vmem %s2096_s13, 256 }
  0x2b   :  { %v139_v9 = vsub.f32 %v67_v4, %v138_v6  ;;  %v161_v11 = vand.u32 4294901760, %v160_v8  ;;  %v3176_v30 = vpack.c.bf16 %v795_v24, %v792_v23  ;;  %v3178_v33 = vpack.c.bf16 %v801_v29, %v798_v26  ;;  %p3059_p2 = scmp.ne.s32.totalorder %s2096_s13, %s3058_s14  ;;  %p3064_p4 = scmp.lt.s32.totalorder %s3058_s14, %s3058_s14 }
  0x2c   :  { %v150_v13 = vand.u32 4294901760, %v149_v10  ;;  %v3183_v36 = vpack.c.bf16 %v807_v32, %v804_v31  ;;  %v813_v38 = vand.u32 4294901760, %v776_v35  ;;  %v3192_v40 = vsub.f32 %v769_v20, %v792_v23 }
  0x2d   :  { %v140_v12 = vand.u32 4294901760, %v139_v9  ;;  %v162_v14 = vsub.f32 %v160_v8, %v161_v11  ;;  %2660 = vmatprep.subr.bf16.mxu1 %v3176_v30  ;;  %v3194_v41 = vsub.f32 %v770_v21, %v795_v24  ;;  %v3204_v46 = vsub.f32 %v771_v22, %v798_v26  ;;  %p3065_p5 = por %p3064_p4, %p3063_p3 }
  0x2e   :  { %v151_v16 = vsub.f32 %v149_v10, %v150_v13  ;;  %2662 = vmatpush3.bf16.msra.mxu1 %v3176_v30  ;;  %v3187_v39 = vpack.c.bf16 %v813_v38, %v810_v37  ;;  %v887_v42 = vand.u32 4294901760, %v3192_v40  ;;  %v3206_v47 = vsub.f32 %v772_v25, %v801_v29 }
  0x2f   :  { %v141_v15 = vsub.f32 %v139_v9, %v140_v12  ;;  %v163_v17 = vand.u32 4294901760, %v162_v14  ;;  %2664 = vmatprep.subr.bf16.mxu1 %v3178_v33  ;;  %v894_v43 = vand.u32 4294901760, %v3194_v41  ;;  %v901_v50 = vand.u32 4294901760, %v3204_v46  ;;  %v2108_v14 = vld [vmem:[%s3665_s2] ss:$0 sm:$0xff]  ;;  %p3066_p6 = pnand %p3065_p5, %p3059_p2 }
  0x30   :  { %v152_v19 = vand.u32 4294901760, %v151_v16  ;;  %v888_v44 = vsub.f32 %v3192_v40, %v887_v42  ;;  %v908_v51 = vand.u32 4294901760, %v3206_v47  ;;  %v3218_v55 = vsub.f32 %v773_v27, %v804_v31 }
  0x31   :  { %v142_v18 = vand.u32 4294901760, %v141_v15  ;;  %2310 = vmatprep.subr.mxu0 %v163_v17  ;;  %v895_v45 = vsub.f32 %v3194_v41, %v894_v43  ;;  %v902_v53 = vsub.f32 %v3204_v46, %v901_v50  ;;  %v3220_v56 = vsub.f32 %v774_v28, %v807_v32 }
  0x32   :  { %2666 = vmatpush3.bf16.msra.mxu1 %v3178_v33  ;;  %v889_v48 = vand.u32 4294901760, %v888_v44  ;;  %v909_v54 = vsub.f32 %v3206_v47, %v908_v51  ;;  %v915_v59 = vand.u32 4294901760, %v3218_v55  ;;  %v3230_v63 = vsub.f32 %v775_v34, %v810_v37 }
  0x33   :  { %2307 = vmatprep.mubr.f32.mxu0 %v142_v18  ;;  %2668 = vmatprep.subr.bf16.mxu1 %v3183_v36  ;;  %v896_v49 = vand.u32 4294901760, %v895_v45  ;;  %v903_v57 = vand.u32 4294901760, %v902_v53  ;;  %v3675_v60 = vand.u32 4294901760, %v3220_v56  ;;  %v3232_v0 = vsub.f32 %v776_v35, %v813_v38 }
  0x34   :  { %2308 = vmatmul.mubr.f32.vlgmr.msra.gmra.mrb[0].mxu0 %v152_v19  ;;  %v910_v58 = vand.u32 4294901760, %v909_v54  ;;  %v916_v62 = vsub.f32 %v3218_v55, %v915_v59  ;;  %v3262_v15 = vpack.c.bf16 %v3220_v56, %v3218_v55 }
  0x35   :  { %2311 = vmatpush3.msra.mxu0 %v163_v17  ;;  %2312 = vmatprep.mubr.f32.mxu0 %v138_v6  ;;  %v3210_v52 = vpack.c.bf16 %v896_v49, %v889_v48  ;;  %v923_v1 = vsub.f32 %v3220_v56, %v3675_v60  ;;  %v3673_v4 = vand.u32 4294901760, %v3232_v0  ;;  %v3274_v25 = vpack.c.bf16 %v3232_v0, %v3230_v63 }
  0x36   :  { %2315 = vmatprep.subr.mxu0 %v160_v8  ;;  %2670 = vmatpush3.bf16.msra.mxu1 %v3183_v36  ;;  %v3225_v61 = vpack.c.bf16 %v910_v58, %v903_v57  ;;  %v917_v2 = vand.u32 4294901760, %v916_v62  ;;  %v3090_v57 = vmov 683565275  }
  0x37   :  { %2672 = vmatprep.subr.bf16.mxu1 %v3187_v39  ;;  %v924_v5 = vand.u32 4294901760, %v923_v1 }
  0x3a   :  { %2674 = vmatpush3.bf16.msra.mxu1 %v3187_v39 }
  0x3b   :  { %2676 = vmatprep.subr.bf16.mxu1 %v3210_v52 }
  0x3c   :  { %2313 = vmatmul.mubr.f32.vlgmr.msra.gmra.mrb[0].mxu0 %v148_v7 }
  0x3d   :  { %2316 = vmatpush3.msra.mxu0 %v160_v8  ;;  %2317 = vmatprep.mubr.f32.mxu0 %v139_v9  ;;  %v3245_v8 = vpack.c.bf16 %v924_v5, %v917_v2  ;;  %v3091_v2 = vmov 2475754826  }
  0x3e   :  { %2320 = vmatprep.subr.mxu0 %v73_v3 }
  0x44   :  { %2318 = vmatmul.mubr.f32.vlgmr.msra.gmra.mrb[0].mxu0 %v149_v10 }
  0x45   :  { %2321 = vmatpush3.msra.mxu0 %v73_v3  ;;  %2322 = vmatprep.mubr.f32.mxu0 %v140_v12  ;;  %v3251_v12 = vpack.c.bf16 %v3194_v41, %v3192_v40  ;;  %v3332_v40 = vpack.c.bf16 %v908_v51, %v901_v50 }
  0x46   :  { %2325 = vmatprep.subr.mxu0 %v161_v11 }
  0x4c   :  { %2323 = vmatmul.mubr.f32.vlgmr.msra.gmra.mrb[0].mxu0 %v150_v13  ;;  %v3255_v13 = vpack.c.bf16 %v3206_v47, %v3204_v46 }
  0x4d   :  { %2326 = vmatpush3.msra.mxu0 %v161_v11  ;;  %2327 = vmatprep.mubr.f32.mxu0 %v138_v6 }
  0x4e   :  { %2330 = vmatprep.subr.mxu0 %v73_v3 }
  0x54   :  { %2328 = vmatmul.mubr.f32.vlgmr.msra.gmra.mrb[0].mxu0 %v148_v7 }
  0x55   :  { %2331 = vmatpush3.msra.mxu0 %v73_v3  ;;  %2332 = vmatprep.mubr.f32.mxu0 %v138_v6  ;;  %v3674_v3 = vand.u32 4294901760, %v3230_v63 }
  0x57   :  { %v930_v6 = vsub.f32 %v3230_v63, %v3674_v3 }
  0x59   :  { %v931_v9 = vand.u32 4294901760, %v930_v6  ;;  %v3092_v6 = vmov 2131351028  }
  0x5c   :  { %2333 = vmatmul.mubr.f32.vlgmr.msra.gmra.mrb[0].mxu0 %v148_v7  ;;  %v937_v7 = vsub.f32 %v3232_v0, %v3673_v4 }
  0x5e   :  { %v938_v10 = vand.u32 4294901760, %v937_v7 }
  0x60   :  { %v3247_v11 = vpack.c.bf16 %v938_v10, %v931_v9  ;;  %v3093_v9 = vmov 2102212464  }
 0x12f   :  { %v2334_v16 = vpop.f32.mrb[0].mxu0 }
 0x130   :  { %v3264_v17 = vadd.f32 %v2334_v16, %v2108_v14  ;;  %v551_v18 = vpop.f32.mrb[1].mxu0 }
 0x131   :  { %v3266_v19 = vadd.f32 %v2108_v14, %v551_v18  ;;  %v3094_v14 = vmov 920167782  }
 0x132   :  { %v3672_v20 = vand.u32 2147483647, %v3264_v17  ;;  %v668_v21 = vand.u32 2139095040, %v3264_v17  ;;  %vm667_vm15 = vcmp.lt.s32.totalorder %v3264_v17, 0 }
 0x133   :  { %v3671_v22 = vand.u32 2147483647, %v3266_v19  ;;  %v564_v23 = vand.u32 2139095040, %v3266_v19 }
 0x134   :  { %v669_v24 = vshrl.u32 %v668_v21, 23  ;;  %v672_v26 = vand.u32 8388607, %v3672_v20 }
 0x135   :  { %v565_v27 = vshrl.u32 %v564_v23, 23  ;;  %v568_v28 = vand.u32 8388607, %v3671_v22 }
 0x136   :  { %v2113_v29 = vadd.s32 4294967169, %v669_v24  ;;  %v673_v34 = vor.u32 8388608, %v672_v26 }
 0x137   :  { %v2109_v31 = vadd.s32 4294967169, %v565_v27  ;;  %v569_v35 = vor.u32 8388608, %v568_v28  ;;  %v3095_v27 = vmov 1326507024  }
 0x138   :  { %v675_v32 = vadd.s32 1, %v2113_v29  ;;  %v3280_v49 = vshll.u32 %v673_v34, 8 }
 0x139   :  { %v571_v37 = vadd.s32 1, %v2109_v31  ;;  %v3282_v53 = vshll.u32 %v569_v35, 8 }
 0x13a   :  { %vm676_vm1 = vcmp.gt.s32.totalorder %v675_v32, 0 }
 0x13b   :  { %v677_v38 = vsel %vm676_vm1, %v675_v32, 0  ;;  %vm572_vm2 = vcmp.gt.s32.totalorder %v571_v37, 0  ;;  %vm563_vm1 = vcmp.lt.s32.totalorder %v3266_v19, 0 }
 0x13c   :  { %v678_v44 = vshrl.u32 %v677_v38, 5  ;;  %v679_v45 = vand.u32 31, %v677_v38  ;;  %v573_v48 = vsel %vm572_vm2, %v571_v37, 0 }
 0x13d   :  { %v3284_v62 = vshrl.u32 %v573_v48, 5  ;;  %v575_v1 = vand.u32 31, %v573_v48 }
 0x13e   :  { %v680_v54 = vsub.s32 32, %v679_v45  ;;  %v682_v58 = vshll.u32 %v3090_v57, %v679_v45  ;;  %v685_v5 = vshll.u32 %v3091_v2, %v679_v45  ;;  %v688_v7 = vshll.u32 %v3092_v6, %v679_v45 }
 0x13f   :  { %v691_v10 = vshll.u32 %v3093_v9, %v679_v45  ;;  %v694_v16 = vshll.u32 %v3094_v14, %v679_v45  ;;  %vm697_vm3 = vcmp.lt.s32.totalorder %v678_v44, 1  ;;  %vm698_vm4 = vcmp.lt.s32.totalorder %v678_v44, 2 }
 0x140   :  { %v683_v18 = vshrl.u32 %v3091_v2, %v680_v54  ;;  %v686_v21 = vshrl.u32 %v3092_v6, %v680_v54  ;;  %v689_v23 = vshrl.u32 %v3093_v9, %v680_v54  ;;  %v681_v24 = vshrl.u32 %v3090_v57, %v680_v54 }
 0x141   :  { %v692_v26 = vshrl.u32 %v3094_v14, %v680_v54  ;;  %v695_v28 = vshrl.u32 %v3095_v27, %v680_v54  ;;  %v576_v34 = vsub.s32 32, %v575_v1  ;;  %vm699_vm5 = vcmp.lt.s32.totalorder %v678_v44, 3 }
 0x142   :  { %v684_v29 = vor.u32 %v683_v18, %v682_v58  ;;  %v687_v31 = vor.u32 %v686_v21, %v685_v5  ;;  %v690_v32 = vor.u32 %v689_v23, %v688_v7  ;;  %vm700_vm6 = vcmp.lt.s32.totalorder %v678_v44, 4 }
 0x143   :  { %v693_v35 = vor.u32 %v692_v26, %v691_v10  ;;  %v696_v37 = vor.u32 %v695_v28, %v694_v16  ;;  %v578_v54 = vshll.u32 %v3090_v57, %v575_v1  ;;  %v579_v5 = vshrl.u32 %v3091_v2, %v576_v34 }
 0x144   :  { %v701_v38 = vsel %vm697_vm3, %v681_v24, %v684_v29  ;;  %v702_v45 = vsel %vm700_vm6, %v690_v32, 2102212464  ;;  %v705_v48 = vsel %vm697_vm3, %v684_v29, %v687_v31  ;;  %v709_v22 = vsel %vm697_vm3, %v687_v31, %v690_v32 }
 0x145   :  { %v703_v20 = vsel %vm699_vm5, %v687_v31, %v702_v45  ;;  %v706_v4 = vsel %vm700_vm6, %v693_v35, 920167782  ;;  %v710_v3 = vsel %vm700_vm6, %v696_v37, 1326507024  ;;  %v581_v7 = vshll.u32 %v3091_v2, %v575_v1 }
 0x146   :  { %v707_v60 = vsel %vm699_vm5, %v690_v32, %v706_v4  ;;  %v711_v58 = vsel %vm699_vm5, %v693_v35, %v710_v3  ;;  %v704_v10 = vsel %vm698_vm4, %v701_v38, %v703_v20  ;;  %v582_v21 = vshrl.u32 %v3092_v6, %v576_v34 }
 0x147   :  { %v708_v16 = vsel %vm698_vm4, %v705_v48, %v707_v60  ;;  %v712_v18 = vsel %vm698_vm4, %v709_v22, %v711_v58  ;;  %v580_v4 = vor.u32 %v579_v5, %v578_v54  ;;  %v584_v29 = vshll.u32 %v3092_v6, %v575_v1 }
 0x148   :  { %v3293_v23 = vmul.u32.u64.low %v3280_v49, %v712_v18  ;;  %v3294_v24 = vmul.u32.u64.high %v3280_v49, %v712_v18, %v3293_v23  ;;  %v3297_v26 = vmul.u32.u64.low %v3280_v49, %v708_v16  ;;  %v3298_v28 = vmul.u32.u64.high %v3280_v49, %v708_v16, %v3297_v26 }
 0x149   :  { %v583_v3 = vor.u32 %v582_v21, %v581_v7  ;;  %v585_v2 = vshrl.u32 %v3093_v9, %v576_v34  ;;  %v577_v31 = vshrl.u32 %v3090_v57, %v576_v34  ;;  %v587_v20 = vshll.u32 %v3093_v9, %v575_v1 }
 0x14a   :  { %v588_v32 = vshrl.u32 %v3094_v14, %v576_v34  ;;  %v591_v60 = vshrl.u32 %v3095_v27, %v576_v34  ;;  %v720_v22 = vmul.u32 %v3280_v49, %v704_v10  ;;  %v590_v35 = vshll.u32 %v3094_v14, %v575_v1 }
 0x14b   :  { %v586_v44 = vor.u32 %v585_v2, %v584_v29  ;;  %vm593_vm7 = vcmp.lt.s32.totalorder %v3284_v62, 1  ;;  %vm722_vm8 = vc.u32 %v3294_v24, %v3297_v26  ;;  %v723_v37 = vadd.s32 1, %v3298_v28 }
 0x14c   :  { %v589_v38 = vor.u32 %v588_v32, %v587_v20  ;;  %vm594_vm9 = vcmp.lt.s32.totalorder %v3284_v62, 2  ;;  %v592_v6 = vor.u32 %v591_v60, %v590_v35  ;;  %vm595_vm10 = vcmp.lt.s32.totalorder %v3284_v62, 3 }
 0x14d   :  { %vm596_vm11 = vcmp.lt.s32.totalorder %v3284_v62, 4  ;;  %v601_v57 = vsel %vm593_vm7, %v580_v4, %v583_v3  ;;  %v724_v49 = vsel %vm722_vm8, %v723_v37, %v3298_v28  ;;  %v605_v14 = vsel %vm593_vm7, %v583_v3, %v586_v44 }
 0x14e   :  { %v598_v9 = vsel %vm596_vm11, %v586_v44, 2102212464  ;;  %v602_v1 = vsel %vm596_vm11, %v589_v38, 920167782  ;;  %v725_v27 = vadd.s32 %v724_v49, %v720_v22  ;;  %v597_v34 = vsel %vm593_vm7, %v577_v31, %v580_v4 }
 0x14f   :  { %v603_v45 = vsel %vm595_vm10, %v586_v44, %v602_v1  ;;  %v606_v48 = vsel %vm596_vm11, %v592_v6, 1326507024  ;;  %v599_v54 = vsel %vm595_vm10, %v583_v3, %v598_v9  ;;  %v3316_v7 = vpack.c.bf16 %v894_v43, %v887_v42 }
 0x150   :  { %v604_v58 = vsel %vm594_vm9, %v601_v57, %v603_v45  ;;  %v607_v5 = vsel %vm595_vm10, %v589_v38, %v606_v48  ;;  %v726_v10 = vadd.s32 536870912, %v725_v27  ;;  %v600_v42 = vsel %vm594_vm9, %v597_v34, %v599_v54  ;;  %v1381_v54 = vld [vmem:[#allocation5] sm:$0xff] }
 0x151   :  { %v608_v16 = vsel %vm594_vm9, %v605_v14, %v607_v5  ;;  %v3321_v18 = vmul.u32.u64.low %v3282_v53, %v604_v58  ;;  %v3322_v21 = vmul.u32.u64.high %v3282_v53, %v604_v58, %v3321_v18  ;;  %v3676_v43 = vand.u32 4294901760, %v3220_v56  ;;  %v1382_v58 = vld [vmem:[#allocation5 + $0x8] sm:$0xff]  ;;  %v1383_v5 = vld [vmem:[#allocation5 + $0x10] sm:$0xff] }
 0x152   :  { %v3325_v23 = vmul.u32.u64.low %v3282_v53, %v608_v16  ;;  %v3326_v28 = vmul.u32.u64.high %v3282_v53, %v608_v16, %v3325_v23  ;;  %v3334_v41 = vshrl.u32 %v726_v10, 30  ;;  %v3677_v3 = vand.u32 4294901760, %v3230_v63  ;;  %v1384_v10 = vld [vmem:[#allocation5 + $0x18] sm:$0xff] }
 0x153   :  { %v3342_v4 = vpack.c.bf16 %v3676_v43, %v915_v59  ;;  %v3678_v29 = vand.u32 4294901760, %v3232_v0  ;;  %v619_v50 = vadd.s32 1, %v3322_v21  ;;  %v616_v51 = vmul.u32 %v3282_v53, %v600_v42 }
 0x154   :  { %v728_v47 = vshll.u32 %v3334_v41, 30  ;;  %vm618_vm12 = vc.u32 %v3326_v28, %v3321_v18  ;;  %v721_v53 = vadd.s32 %v3297_v26, %v3294_v24  ;;  %v751_v45 = vsub.s32 4, %v3334_v41 }
 0x155   :  { %v3348_v46 = vpack.c.bf16 %v3678_v29, %v3677_v3  ;;  %v620_v55 = vsel %vm618_vm12, %v619_v50, %v3322_v21  ;;  %v617_v48 = vadd.s32 %v3321_v18, %v3326_v28  ;;  %v1405_v24 = vand.u32 4294901760, %v1381_v54 }
 0x156   :  { %v729_v62 = vsub.s32 %v725_v27, %v728_v47  ;;  %v621_v56 = vadd.s32 %v620_v55, %v616_v51  ;;  %v1408_v26 = vand.u32 4294901760, %v1382_v58  ;;  %v1411_v16 = vand.u32 4294901760, %v1383_v5 }
 0x157   :  { %v1414_v43 = vand.u32 4294901760, %v1384_v10  ;;  %vm784_vm6 = vcmask 523264   ;;  %vm757_vm7 = vweird.f32 %v3264_v17  ;;  %vm653_vm11 = vweird.f32 %v3266_v19 }
 0x158   :  { %v731_v59 = vsub.s32 0, %v729_v62  ;;  %v622_v2 = vadd.s32 536870912, %v621_v56  ;;  %v3362_v50 = vpack.c.bf16 %v1408_v26, %v1405_v24  ;;  %v3366_v18 = vsub.f32 %v1382_v58, %v1408_v26 }
 0x159   :  { %v3368_v28 = vpack.c.bf16 %v1414_v43, %v1411_v16 }
 0x15a   :  { %v2114_v31 = vmin.u32 %v731_v59, %v729_v62  ;;  %v3355_v63 = vshrl.u32 %v622_v2, 30  ;;  %v3370_v59 = vsub.f32 %v1383_v5, %v1411_v16  ;;  %v3372_v2 = vsub.f32 %v1384_v10, %v1414_v43 }
 0x15c   :  { %v733_v0 = vclz %v2114_v31  ;;  %v624_v20 = vshll.u32 %v3355_v63, 30 }
 0x15e   :  { %v2115_v32 = vadd.s32 4294967294, %v733_v0  ;;  %v625_v60 = vsub.s32 %v621_v56, %v624_v20 }
 0x160   :  { %vm2116_vm13 = vcmp.lt.s32.totalorder %v2115_v32, 0  ;;  %v627_v44 = vsub.s32 0, %v625_v60 }
 0x161   :  { %v736_v22 = vsel %vm2116_vm13, 0, %v2115_v32 }
 0x162   :  { %v737_v35 = vsub.s32 32, %v736_v22  ;;  %v741_v37 = vsub.s32 4294967266, %v736_v22  ;;  %v2110_v38 = vmin.u32 %v627_v44, %v625_v60  ;;  %v738_v6 = vshll.u32 %v729_v62, %v736_v22 }
 0x163   :  { %v3364_v62 = vsub.f32 %v1381_v54, %v1405_v24  ;;  %v3679_v22 = vand.u32 2147483647, %v3264_v17 }
 0x164   :  { %v739_v57 = vshrl.u32 %v721_v53, %v737_v35  ;;  %v742_v49 = vadd.s32 127, %v741_v37  ;;  %v629_v9 = vclz %v2110_v38  ;;  %v752_v35 = vsel %vm667_vm15, %v751_v45, %v3334_v41 }
 0x165   :  { %v2819_v0 = vpack.c.bf16 %v3366_v18, %v3364_v62  ;;  %vm3381_vm0 = vcmp.le.f32.partialorder %v3679_v22, 0.7853982 }
 0x166   :  { %v740_v1 = vor.u32 %v739_v57, %v738_v6  ;;  %v743_v14 = vshll.u32 %v742_v49, 23  ;;  %v2111_v27 = vadd.s32 4294967294, %v629_v9  ;;  %v754_v6 = vsel %vm3381_vm0, 0, %v752_v35 }
 0x167   :  { %2820 = vmatprep.subr.bf16.mxu0 %v2819_v0  ;;  %v758_v41 = vadd.s32 3, %v754_v6 }
 0x168   :  { %v744_v34 = vor.u32 4788187, %v743_v14  ;;  %vm2112_vm14 = vcmp.lt.s32.totalorder %v2111_v27, 0  ;;  %v747_v23 = vcvt.s32.f32 %v740_v1  ;;  %2822 = vmatpush3.bf16.msra.mxu0 %v2819_v0  ;;  %v647_v1 = vsub.s32 4, %v3355_v63 }
 0x169   :  { %v632_v42 = vsel %vm2112_vm14, 0, %v2111_v27  ;;  %v3682_v27 = vand.u32 2147483647, %v3266_v19  ;;  %v759_v54 = vand.u32 3, %v758_v41 }
 0x16a   :  { %v745_v21 = vand.u32 2147483647, %v744_v34  ;;  %v633_v3 = vsub.s32 32, %v632_v42  ;;  %v634_v29 = vshll.u32 %v625_v60, %v632_v42  ;;  %v637_v47 = vsub.s32 4294967266, %v632_v42 }
 0x16b   :  { %v2823_v60 = vpack.c.bf16 %v3372_v2, %v3370_v59  ;;  %vm562_vm2 = vcmp.le.f32.partialorder %v3682_v27, 0.7853982  ;;  %v648_v45 = vsel %vm563_vm1, %v647_v1, %v3355_v63  ;;  %vm764_vm3 = vcmp.eq.s32.totalorder %v759_v54, 2  ;;  %v1392_v27 = vld [vmem:[#allocation5 + $0x58] sm:$0xff] }
 0x16c   :  { %v748_v51 = vmul.f32 %v747_v23, %v745_v21  ;;  %v635_v55 = vshrl.u32 %v617_v48, %v633_v3  ;;  %v638_v56 = vadd.s32 127, %v637_v47  ;;  %v650_v5 = vsel %vm562_vm2, 0, %v648_v45 }
 0x16d   :  { %2824 = vmatprep.subr.bf16.mxu0 %v2823_v60  ;;  %v654_v16 = vadd.s32 3, %v650_v5  ;;  %vm761_vm4 = vcmp.eq.s32.totalorder %v759_v54, 0  ;;  %vm760_vm5 = vcmp.lt.s32.totalorder %v759_v54, 2 }
 0x16e   :  { %v749_v31 = vxor.u32 2147483648, %v748_v51  ;;  %v636_v20 = vor.u32 %v635_v55, %v634_v29  ;;  %v639_v32 = vshll.u32 %v638_v56, 23  ;;  %2826 = vmatpush3.bf16.msra.mxu0 %v2823_v60 }
 0x16f   :  { %v655_v43 = vand.u32 3, %v654_v16 }
 0x170   :  { %v750_v53 = vsel %vm667_vm15, %v749_v31, %v748_v51  ;;  %v640_v38 = vor.u32 4788187, %v639_v32  ;;  %v643_v49 = vcvt.s32.f32 %v636_v20 }
 0x171   :  { %v753_v37 = vsel %vm3381_vm0, %v3264_v17, %v750_v53  ;;  %vm660_vm8 = vcmp.eq.s32.totalorder %v655_v43, 2  ;;  %vm657_vm9 = vcmp.eq.s32.totalorder %v655_v43, 0  ;;  %vm656_vm10 = vcmp.lt.s32.totalorder %v655_v43, 2  ;;  %v1395_v43 = vld [vmem:[#allocation5 + $0x70] sm:$0xff] }
 0x172   :  { %3002 = vcosq.f32 %v753_v37  ;;  %v641_v57 = vand.u32 2147483647, %v640_v38 }
 0x173   :  { %3004 = vsinq.f32 %v753_v37 }
 0x174   :  { %v644_v9 = vmul.f32 %v643_v49, %v641_v57 }
 0x176   :  { %v645_v14 = vxor.u32 2147483648, %v644_v9 }
 0x178   :  { %v646_v34 = vsel %vm563_vm1, %v645_v14, %v644_v9  ;;  %v1391_v14 = vld [vmem:[#allocation5 + $0x50] sm:$0xff] }
 0x179   :  { %v649_v48 = vsel %vm562_vm2, %v3266_v19, %v646_v34  ;;  %v1435_v45 = vand.u32 4294901760, %v1391_v14 }
 0x17a   :  { %3006 = vcosq.f32 %v649_v48 }
 0x17b   :  { %3008 = vsinq.f32 %v649_v48  ;;  %v1438_v48 = vand.u32 4294901760, %v1392_v27 }
 0x17c   :  { %v3003_v58 = vpop.eup %3002 }
 0x17d   :  { %v3005_v24 = vpop.eup %3004  ;;  %v765_v26 = vxor.u32 2147483648, %v3003_v58  ;;  %v3476_v5 = vsub.f32 %v1392_v27, %v1438_v48 }
 0x17e   :  { %v762_v10 = vxor.u32 2147483648, %v3005_v24 }
 0x17f   :  { %v766_v21 = vsel %vm764_vm3, %v765_v26, %v3005_v24  ;;  %v1393_v24 = vld [vmem:[#allocation5 + $0x60] sm:$0xff]  ;;  %v1394_v26 = vld [vmem:[#allocation5 + $0x68] sm:$0xff] }
 0x180   :  { %v763_v23 = vsel %vm761_vm4, %v3003_v58, %v762_v10  ;;  %v3474_v58 = vsub.f32 %v1391_v14, %v1435_v45  ;;  %v1441_v16 = vand.u32 4294901760, %v1393_v24 }
 0x181   :  { %v767_v63 = vsel %vm760_vm5, %v763_v23, %v766_v21  ;;  %v1444_v21 = vand.u32 4294901760, %v1394_v26 }
 0x182   :  { %v768_v42 = vsel %vm757_vm7, nan, %v767_v63  ;;  %v2839_v10 = vpack.c.bf16 %v3476_v5, %v3474_v58  ;;  %v3484_v63 = vsub.f32 %v1393_v24, %v1441_v16 }
 0x183   :  { %v789_v3 = vsel %vm784_vm6, %v768_v42, 0  ;;  %v3486_v42 = vsub.f32 %v1394_v26, %v1444_v21 }
 0x184   :  { %v3007_v29 = vpop.eup %3006  ;;  %v3399_v55 = vand.u32 4294901760, %v789_v3 }
 0x185   :  { %v3009_v47 = vpop.eup %3008  ;;  %v661_v51 = vxor.u32 2147483648, %v3007_v29 }
 0x186   :  { %v658_v56 = vxor.u32 2147483648, %v3009_v47  ;;  %v875_v17 = vsub.f32 %v789_v3, %v3399_v55  ;;  %v1396_v3 = vld [vmem:[#allocation5 + $0x78] sm:$0xff] }
 0x187   :  { %v662_v31 = vsel %vm660_vm8, %v661_v51, %v3009_v47  ;;  %v1447_v47 = vand.u32 4294901760, %v1395_v43  ;;  %v1450_v51 = vand.u32 4294901760, %v1396_v3 }
 0x188   :  { %v659_v0 = vsel %vm657_vm9, %v3007_v29, %v658_v56  ;;  %v876_v44 = vand.u32 4294901760, %v875_v17  ;;  %v2843_v29 = vpack.c.bf16 %v3486_v42, %v3484_v63 }
 0x189   :  { %v663_v20 = vsel %vm656_vm10, %v659_v0, %v662_v31  ;;  %v3494_v56 = vsub.f32 %v1395_v43, %v1447_v47  ;;  %v3496_v31 = vsub.f32 %v1396_v3, %v1450_v51  ;;  %v3498_v0 = vpack.c.bf16 %v1444_v21, %v1441_v16 }
 0x18a   :  { %v664_v32 = vsel %vm653_vm11, nan, %v663_v20  ;;  %v877_v37 = vsub.f32 %v875_v17, %v876_v44 }
 0x18b   :  { %v786_v60 = vsel %vm784_vm6, %v664_v32, 0  ;;  %v2847_v20 = vpack.c.bf16 %v3496_v31, %v3494_v56  ;;  %v1508_v32 = vand.u32 4294901760, %v3364_v62  ;;  %v1606_v21 = vand.u32 4294901760, %v3494_v56 }
 0x18c   :  { %v864_v22 = vand.u32 4294901760, %v786_v60  ;;  %v878_v57 = vand.u32 4294901760, %v877_v37 }
 0x18e   :  { %v865_v53 = vsub.f32 %v786_v60, %v864_v22  ;;  %v1515_v60 = vand.u32 4294901760, %v3366_v18 }
 0x190   :  { %v866_v35 = vand.u32 4294901760, %v865_v53 }
 0x192   :  { %v867_v38 = vsub.f32 %v865_v53, %v866_v35 }
 0x194   :  { %v868_v6 = vand.u32 4294901760, %v867_v38 }
 0x196   :  { %2351 = vmatprep.mubr.f32.mxu1 %v868_v6 }
 0x197   :  { %2352 = vmatmul.mubr.f32.vlgmr.msra.gmra.mrb[0].mxu1 %v878_v57 }
 0x198   :  { %2678 = vmatpush3.bf16.msra.mxu1 %v3210_v52  ;;  %2370 = vmatprep.mubr.f32.mxu1 %v864_v22 }
 0x199   :  { %2680 = vmatprep.subr.bf16.mxu1 %v3225_v61 }
 0x19c   :  { %2682 = vmatpush3.bf16.msra.mxu1 %v3225_v61 }
 0x19d   :  { %2684 = vmatprep.subr.bf16.mxu1 %v3245_v8 }
 0x1a0   :  { %2686 = vmatpush3.bf16.msra.mxu1 %v3245_v8 }
 0x1a1   :  { %2688 = vmatprep.subr.bf16.mxu1 %v3247_v11 }
 0x1a4   :  { %2690 = vmatpush3.bf16.msra.mxu1 %v3247_v11  ;;  %v1387_v11 = vld [vmem:[#allocation5 + $0x30] sm:$0xff] }
 0x1a5   :  { %2692 = vmatprep.subr.bf16.mxu1 %v3251_v12 }
 0x1a7   :  { %2371 = vmatmul.mubr.f32.vlgmr.msra.gmra.mrb[0].mxu1 %v3399_v55 }
 0x1a8   :  { %2694 = vmatpush3.bf16.msra.mxu1 %v3251_v12  ;;  %2389 = vmatprep.mubr.f32.mxu1 %v865_v53 }
 0x1a9   :  { %2696 = vmatprep.subr.bf16.mxu1 %v3255_v13 }
 0x1ac   :  { %2698 = vmatpush3.bf16.msra.mxu1 %v3255_v13  ;;  %v1423_v13 = vand.u32 4294901760, %v1387_v11 }
 0x1ad   :  { %2700 = vmatprep.subr.bf16.mxu1 %v3262_v15 }
 0x1ae   :  { %v3456_v19 = vsub.f32 %v1387_v11, %v1423_v13 }
 0x1b0   :  { %2702 = vmatpush3.bf16.msra.mxu1 %v3262_v15 }
 0x1b1   :  { %2704 = vmatprep.subr.bf16.mxu1 %v3274_v25 }
 0x1b4   :  { %2706 = vmatpush3.bf16.msra.mxu1 %v3274_v25 }
 0x1b5   :  { %2708 = vmatprep.subr.bf16.mxu1 %v3176_v30 }
 0x1b7   :  { %2390 = vmatmul.mubr.f32.vlgmr.msra.gmra.mrb[0].mxu1 %v875_v17  ;;  %v3504_v17 = vpack.c.bf16 %v1450_v51, %v1447_v47 }
 0x1b8   :  { %2710 = vmatpush3.bf16.msra.mxu1 %v3176_v30  ;;  %2408 = vmatprep.mubr.f32.mxu1 %v866_v35 }
 0x1b9   :  { %2712 = vmatprep.subr.bf16.mxu1 %v3178_v33 }
 0x1bc   :  { %2714 = vmatpush3.bf16.msra.mxu1 %v3178_v33 }
 0x1bd   :  { %2716 = vmatprep.subr.bf16.mxu1 %v3183_v36 }
 0x1c0   :  { %2718 = vmatpush3.bf16.msra.mxu1 %v3183_v36 }
 0x1c1   :  { %2720 = vmatprep.subr.bf16.mxu1 %v3187_v39 }
 0x1c4   :  { %2722 = vmatpush3.bf16.msra.mxu1 %v3187_v39 }
 0x1c5   :  { %2724 = vmatprep.subr.bf16.mxu1 %v3316_v7 }
 0x1c7   :  { %2409 = vmatmul.mubr.f32.vlgmr.msra.gmra.mrb[0].mxu1 %v876_v44  ;;  %v1516_v44 = vsub.f32 %v3366_v18, %v1515_v60  ;;  %v1550_v18 = vand.u32 4294901760, %v3456_v19 }
 0x1c8   :  { %2726 = vmatpush3.bf16.msra.mxu1 %v3316_v7  ;;  %2427 = vmatprep.mubr.f32.mxu1 %v864_v22  ;;  %v1389_v7 = vld [vmem:[#allocation5 + $0x40] sm:$0xff] }
 0x1c9   :  { %2728 = vmatprep.subr.bf16.mxu1 %v3332_v40  ;;  %v1517_v35 = vand.u32 4294901760, %v1516_v44  ;;  %v1551_v11 = vsub.f32 %v3456_v19, %v1550_v18 }
 0x1cc   :  { %2730 = vmatpush3.bf16.msra.mxu1 %v3332_v40  ;;  %v1390_v40 = vld [vmem:[#allocation5 + $0x48] sm:$0xff] }
 0x1cd   :  { %2732 = vmatprep.subr.bf16.mxu1 %v3342_v4  ;;  %v1432_v49 = vand.u32 4294901760, %v1390_v40 }
 0x1cf   :  { %v3466_v41 = vsub.f32 %v1390_v40, %v1432_v49 }
 0x1d0   :  { %2734 = vmatpush3.bf16.msra.mxu1 %v3342_v4 }
 0x1d1   :  { %2736 = vmatprep.subr.bf16.mxu1 %v3348_v46 }
 0x1d4   :  { %2738 = vmatpush3.bf16.msra.mxu1 %v3348_v46  ;;  %v1429_v46 = vand.u32 4294901760, %v1389_v7 }
 0x1d5   :  { %2740 = vmatprep.subr.bf16.mxu1 %v3176_v30 }
 0x1d6   :  { %v3464_v1 = vsub.f32 %v1389_v7, %v1429_v46  ;;  %v3482_v23 = vpack.c.bf16 %v1432_v49, %v1429_v46  ;;  %v1578_v49 = vand.u32 4294901760, %v3474_v58 }
 0x1d7   :  { %2428 = vmatmul.mubr.f32.vlgmr.msra.gmra.mrb[0].mxu1 %v3399_v55 }
 0x1d8   :  { %2742 = vmatpush3.bf16.msra.mxu1 %v3176_v30  ;;  %2446 = vmatprep.mubr.f32.mxu1 %v864_v22  ;;  %v1385_v30 = vld [vmem:[#allocation5 + $0x20] sm:$0xff]  ;;  %v2835_v34 = vpack.c.bf16 %v3466_v41, %v3464_v1  ;;  %v1509_v22 = vsub.f32 %v3364_v62, %v1508_v32 }
 0x1d9   :  { %2744 = vmatprep.subr.bf16.mxu1 %v3178_v33  ;;  %v1417_v52 = vand.u32 4294901760, %v1385_v30 }
 0x1da   :  { %v1510_v53 = vand.u32 4294901760, %v1509_v22 }
 0x1db   :  { %v3450_v8 = vsub.f32 %v1385_v30, %v1417_v52 }
 0x1dc   :  { %2746 = vmatpush3.bf16.msra.mxu1 %v3178_v33  ;;  %v1386_v33 = vld [vmem:[#allocation5 + $0x28] sm:$0xff]  ;;  %v3515_v37 = vpack.c.bf16 %v1517_v35, %v1510_v53 }
 0x1dd   :  { %2748 = vmatprep.subr.bf16.mxu1 %v3183_v36  ;;  %v1420_v61 = vand.u32 4294901760, %v1386_v33  ;;  %v1536_v38 = vand.u32 4294901760, %v3450_v8 }
 0x1df   :  { %v3462_v9 = vpack.c.bf16 %v1420_v61, %v1417_v52  ;;  %v1537_v57 = vsub.f32 %v3450_v8, %v1536_v38 }
 0x1e0   :  { %2750 = vmatpush3.bf16.msra.mxu1 %v3183_v36  ;;  %v3452_v36 = vsub.f32 %v1386_v33, %v1420_v61 }
 0x1e1   :  { %2752 = vmatprep.subr.bf16.mxu1 %v3187_v39  ;;  %v1538_v33 = vand.u32 4294901760, %v1537_v57 }
 0x1e2   :  { %v2827_v12 = vpack.c.bf16 %v3452_v36, %v3450_v8  ;;  %v1543_v6 = vand.u32 4294901760, %v3452_v36  ;;  %v1571_v8 = vand.u32 4294901760, %v3466_v41 }
 0x1e4   :  { %2754 = vmatpush3.bf16.msra.mxu1 %v3187_v39  ;;  %v1388_v39 = vld [vmem:[#allocation5 + $0x38] sm:$0xff]  ;;  %2828 = vmatprep.subr.bf16.mxu0 %v2827_v12  ;;  %v1544_v30 = vsub.f32 %v3452_v36, %v1543_v6  ;;  %v1572_v40 = vsub.f32 %v3466_v41, %v1571_v8 }
 0x1e5   :  { %2756 = vmatprep.subr.bf16.mxu1 %v3362_v50  ;;  %v1426_v15 = vand.u32 4294901760, %v1388_v39  ;;  %2830 = vmatpush3.bf16.msra.mxu0 %v2827_v12  ;;  %v1552_v12 = vand.u32 4294901760, %v1551_v11 }
 0x1e6   :  { %v1545_v62 = vand.u32 4294901760, %v1544_v30  ;;  %v1573_v46 = vand.u32 4294901760, %v1572_v40 }
 0x1e7   :  { %2447 = vmatmul.mubr.f32.vlgmr.msra.gmra.mrb[0].mxu1 %v3399_v55  ;;  %v3458_v25 = vsub.f32 %v1388_v39, %v1426_v15  ;;  %v3472_v54 = vpack.c.bf16 %v1426_v15, %v1423_v13  ;;  %v3492_v55 = vpack.c.bf16 %v1438_v48, %v1435_v45  ;;  %v1564_v15 = vand.u32 4294901760, %v3464_v1 }
 0x1e8   :  { %2758 = vmatpush3.bf16.msra.mxu1 %v3362_v50  ;;  %v3524_v61 = vpack.c.bf16 %v1545_v62, %v1538_v33  ;;  %v1592_v48 = vand.u32 4294901760, %v3484_v63 }
 0x1e9   :  { %2760 = vmatprep.subr.bf16.mxu1 %v3368_v28  ;;  %v2831_v4 = vpack.c.bf16 %v3458_v25, %v3456_v19  ;;  %v1557_v52 = vand.u32 4294901760, %v3458_v25  ;;  %v1565_v36 = vsub.f32 %v3464_v1, %v1564_v15  ;;  %v1585_v19 = vand.u32 4294901760, %v3476_v5 }
 0x1ea   :  { %v1599_v1 = vand.u32 4294901760, %v3486_v42  ;;  %v1593_v41 = vsub.f32 %v3484_v63, %v1592_v48  ;;  %v3556_v63 = vpack.c.bf16 %v1543_v6, %v1536_v38  ;;  %v3560_v22 = vpack.c.bf16 %v1571_v8, %v1564_v15 }
 0x1eb   :  { %2832 = vmatprep.subr.bf16.mxu0 %v2831_v4  ;;  %v1558_v39 = vsub.f32 %v3458_v25, %v1557_v52  ;;  %v1579_v25 = vsub.f32 %v3474_v58, %v1578_v49  ;;  %v1586_v27 = vsub.f32 %v3476_v5, %v1585_v19  ;;  %v1613_v58 = vand.u32 4294901760, %v3496_v31 }
 0x1ec   :  { %2762 = vmatpush3.bf16.msra.mxu1 %v3368_v28  ;;  %2834 = vmatpush3.bf16.msra.mxu0 %v2831_v4  ;;  %v1566_v4 = vand.u32 4294901760, %v1565_v36  ;;  %v1600_v26 = vsub.f32 %v3486_v42, %v1599_v1  ;;  %v1607_v5 = vsub.f32 %v3494_v56, %v1606_v21  ;;  %v3558_v42 = vpack.c.bf16 %v1557_v52, %v1550_v18  ;;  %v2117_v56 = vld [vmem:[%s3667_s4] ss:$0 sm:$0xff] }
 0x1ed   :  { %2764 = vmatprep.subr.bf16.mxu1 %v3462_v9  ;;  %2836 = vmatprep.subr.bf16.mxu0 %v2835_v34  ;;  %v1559_v13 = vand.u32 4294901760, %v1558_v39  ;;  %v1587_v45 = vand.u32 4294901760, %v1586_v27  ;;  %v1614_v3 = vsub.f32 %v3496_v31, %v1613_v58  ;;  %v3562_v44 = vpack.c.bf16 %v1585_v19, %v1578_v49 }
 0x1ee   :  { %v3536_v14 = vpack.c.bf16 %v1573_v46, %v1566_v4  ;;  %v1601_v16 = vand.u32 4294901760, %v1600_v26  ;;  %v1608_v47 = vand.u32 4294901760, %v1607_v5  ;;  %v3564_v53 = vpack.c.bf16 %v1599_v1, %v1592_v48 }
 0x1ef   :  { %v3530_v7 = vpack.c.bf16 %v1559_v13, %v1552_v12  ;;  %v1615_v51 = vand.u32 4294901760, %v1614_v3  ;;  %v3566_v35 = vpack.c.bf16 %v1613_v58, %v1606_v21  ;;  %v1522_v12 = vand.u32 4294901760, %v3370_v59 }
 0x1f0   :  { %2766 = vmatpush3.bf16.msra.mxu1 %v3462_v9  ;;  %2838 = vmatpush3.bf16.msra.mxu0 %v2835_v34  ;;  %v1580_v34 = vand.u32 4294901760, %v1579_v25  ;;  %v1529_v13 = vand.u32 4294901760, %v3372_v2 }
 0x1f1   :  { %2768 = vmatprep.subr.bf16.mxu1 %v3472_v54  ;;  %2840 = vmatprep.subr.bf16.mxu0 %v2839_v10  ;;  %v1523_v4 = vsub.f32 %v3370_v59, %v1522_v12 }
 0x1f2   :  { %v3542_v24 = vpack.c.bf16 %v1587_v45, %v1580_v34  ;;  %v1530_v46 = vsub.f32 %v3372_v2, %v1529_v13  ;;  %v2887_v2 = vpack.c.bf16 %v1529_v13, %v1522_v12 }
 0x1f3   :  { %v1524_v34 = vand.u32 4294901760, %v1523_v4 }
 0x1f4   :  { %2770 = vmatpush3.bf16.msra.mxu1 %v3472_v54  ;;  %2842 = vmatpush3.bf16.msra.mxu0 %v2839_v10  ;;  %v1594_v10 = vand.u32 4294901760, %v1593_v41  ;;  %v1531_v45 = vand.u32 4294901760, %v1530_v46 }
 0x1f5   :  { %2772 = vmatprep.subr.bf16.mxu1 %v3482_v23  ;;  %2844 = vmatprep.subr.bf16.mxu0 %v2843_v29 }
 0x1f6   :  { %v3548_v43 = vpack.c.bf16 %v1601_v16, %v1594_v10  ;;  %v2791_v59 = vpack.c.bf16 %v1531_v45, %v1524_v34 }
 0x1f8   :  { %2774 = vmatpush3.bf16.msra.mxu1 %v3482_v23  ;;  %2846 = vmatpush3.bf16.msra.mxu0 %v2843_v29  ;;  %v3552_v29 = vpack.c.bf16 %v1515_v60, %v1508_v32 }
 0x1f9   :  { %2776 = vmatprep.subr.bf16.mxu1 %v3492_v55  ;;  %2848 = vmatprep.subr.bf16.mxu0 %v2847_v20 }
 0x1fc   :  { %2778 = vmatpush3.bf16.msra.mxu1 %v3492_v55  ;;  %2850 = vmatpush3.bf16.msra.mxu0 %v2847_v20  ;;  %v3554_v20 = vpack.c.bf16 %v1615_v51, %v1608_v47 }
 0x1fd   :  { %2780 = vmatprep.subr.bf16.mxu1 %v3498_v0  ;;  %2852 = vmatprep.subr.bf16.mxu0 %v3362_v50 }
 0x200   :  { %2782 = vmatpush3.bf16.msra.mxu1 %v3498_v0 }
 0x201   :  { %2784 = vmatprep.subr.bf16.mxu1 %v3504_v17 }
 0x204   :  { %2786 = vmatpush3.bf16.msra.mxu1 %v3504_v17 }
 0x205   :  { %2788 = vmatprep.subr.bf16.mxu1 %v3515_v37 }
 0x2ba   :  { %v2448_v31 = vpop.f32.mrb[0].mxu1 }
 0x2bb   :  { %v2949_v32 = vadd.f32 %v2448_v31, %v2117_v56  ;;  %v1361_v60 = vpop.f32.mrb[1].mxu1 }
 0x2bc   :  { %v2950_v57 = vadd.f32 %v2117_v56, %v1361_v60 }
 0x2bd   :  { %v1374_v38 = vmul.f32 0.70710677, %v2949_v32  ;;  %v1372_v62 = vmul.f32 0.5, %v2949_v32 }
 0x2be   :  { %v1373_v6 = vmul.f32 0.70710677, %v2950_v57  ;;  %v1371_v52 = vmul.f32 0.5, %v2950_v57 }
 0x2bf   :  { %3010 = verf.f32 %v1374_v38 }
 0x2c0   :  { %3012 = verf.f32 %v1373_v6 }
 0x2c9   :  { %v3011_v30 = vpop.eup %3010 }
 0x2ca   :  { %v3013_v33 = vpop.eup %3012  ;;  %v1378_v18 = vadd.f32 1.0, %v3011_v30 }
 0x2cb   :  { %v1377_v11 = vadd.f32 1.0, %v3013_v33 }
 0x2cc   :  { %v1380_v39 = vmul.f32 %v1378_v18, %v1372_v62 }
 0x2cd   :  { %v1379_v15 = vmul.f32 %v1377_v11, %v1371_v52 }
 0x2ce   :  { %v3573_v8 = vand.u32 4294901760, %v1380_v39 }
 0x2cf   :  { %v3575_v36 = vand.u32 4294901760, %v1379_v15 }
 0x2d0   :  { %v1496_v40 = vsub.f32 %v1380_v39, %v3573_v8 }
 0x2d1   :  { %v1486_v49 = vsub.f32 %v1379_v15, %v3575_v36 }
 0x2d2   :  { %v1497_v19 = vand.u32 4294901760, %v1496_v40 }
 0x2d3   :  { %2551 = vmatprep.mubr.f32.mxu0 %v1486_v49  ;;  %v1487_v25 = vand.u32 4294901760, %v1486_v49 }
 0x2d4   :  { %2552 = vmatmul.mubr.f32.vlgmr.msra.gmra.mrb[2].mxu0 %v1496_v40  ;;  %v1498_v27 = vsub.f32 %v1496_v40, %v1497_v19 }
 0x2d5   :  { %2854 = vmatpush3.bf16.msra.mxu0 %v3362_v50  ;;  %2586 = vmatprep.mubr.f32.mxu0 %v1487_v25  ;;  %v1488_v48 = vsub.f32 %v1486_v49, %v1487_v25 }
 0x2d6   :  { %2856 = vmatprep.subr.bf16.mxu0 %v3368_v28  ;;  %v1499_v41 = vand.u32 4294901760, %v1498_v27 }
 0x2d7   :  { %v1489_v1 = vand.u32 4294901760, %v1488_v48 }
 0x2d9   :  { %2858 = vmatpush3.bf16.msra.mxu0 %v3368_v28  ;;  %2481 = vmatprep.mubr.f32.mxu1 %v1489_v1 }
 0x2da   :  { %2482 = vmatmul.mubr.f32.vlgmr.msra.gmra.mrb[2].mxu1 %v1499_v41  ;;  %2860 = vmatprep.subr.bf16.mxu0 %v3462_v9 }
 0x2db   :  { %2790 = vmatpush3.bf16.msra.mxu1 %v3515_v37  ;;  %2516 = vmatprep.mubr.f32.mxu1 %v3575_v36 }
 0x2dc   :  { %2792 = vmatprep.subr.bf16.mxu1 %v2791_v59 }
 0x2dd   :  { %2862 = vmatpush3.bf16.msra.mxu0 %v3462_v9 }
 0x2de   :  { %2864 = vmatprep.subr.bf16.mxu0 %v3472_v54 }
 0x2df   :  { %2794 = vmatpush3.bf16.msra.mxu1 %v2791_v59 }
 0x2e0   :  { %2796 = vmatprep.subr.bf16.mxu1 %v3524_v61 }
 0x2e1   :  { %2866 = vmatpush3.bf16.msra.mxu0 %v3472_v54 }
 0x2e2   :  { %2868 = vmatprep.subr.bf16.mxu0 %v3482_v23 }
 0x2e3   :  { %2798 = vmatpush3.bf16.msra.mxu1 %v3524_v61 }
 0x2e4   :  { %2800 = vmatprep.subr.bf16.mxu1 %v3530_v7 }
 0x2e5   :  { %2870 = vmatpush3.bf16.msra.mxu0 %v3482_v23 }
 0x2e6   :  { %2872 = vmatprep.subr.bf16.mxu0 %v3492_v55 }
 0x2e7   :  { %2802 = vmatpush3.bf16.msra.mxu1 %v3530_v7 }
 0x2e8   :  { %2804 = vmatprep.subr.bf16.mxu1 %v3536_v14 }
 0x2e9   :  { %2874 = vmatpush3.bf16.msra.mxu0 %v3492_v55 }
 0x2ea   :  { %2876 = vmatprep.subr.bf16.mxu0 %v3498_v0 }
 0x2eb   :  { %2806 = vmatpush3.bf16.msra.mxu1 %v3536_v14 }
 0x2ec   :  { %2808 = vmatprep.subr.bf16.mxu1 %v3542_v24 }
 0x2ed   :  { %2878 = vmatpush3.bf16.msra.mxu0 %v3498_v0 }
 0x2ee   :  { %2880 = vmatprep.subr.bf16.mxu0 %v3504_v17 }
 0x2ef   :  { %2810 = vmatpush3.bf16.msra.mxu1 %v3542_v24 }
 0x2f0   :  { %2812 = vmatprep.subr.bf16.mxu1 %v3548_v43 }
 0x2f1   :  { %2882 = vmatpush3.bf16.msra.mxu0 %v3504_v17 }
 0x2f2   :  { %2884 = vmatprep.subr.bf16.mxu0 %v3552_v29 }
 0x2f3   :  { %2814 = vmatpush3.bf16.msra.mxu1 %v3548_v43 }
 0x2f4   :  { %2587 = vmatmul.mubr.f32.vlgmr.msra.gmra.mrb[2].mxu0 %v1497_v19  ;;  %2816 = vmatprep.subr.bf16.mxu1 %v3554_v20 }
 0x2f5   :  { %2886 = vmatpush3.bf16.msra.mxu0 %v3552_v29  ;;  %2621 = vmatprep.mubr.f32.mxu0 %v3575_v36 }
 0x2f6   :  { %2888 = vmatprep.subr.bf16.mxu0 %v2887_v2 }
 0x2f7   :  { %2818 = vmatpush3.bf16.msra.mxu1 %v3554_v20 }
 0x2f9   :  { %2890 = vmatpush3.bf16.msra.mxu0 %v2887_v2 }
 0x2fa   :  { %2517 = vmatmul.mubr.f32.vlgmr.msra.gmra.mrb[2].mxu1 %v3573_v8  ;;  %2892 = vmatprep.subr.bf16.mxu0 %v3556_v63 }
 0x2fd   :  { %2894 = vmatpush3.bf16.msra.mxu0 %v3556_v63 }
 0x2fe   :  { %2896 = vmatprep.subr.bf16.mxu0 %v3558_v42 }
 0x301   :  { %2898 = vmatpush3.bf16.msra.mxu0 %v3558_v42 }
 0x302   :  { %2900 = vmatprep.subr.bf16.mxu0 %v3560_v22 }
 0x305   :  { %2902 = vmatpush3.bf16.msra.mxu0 %v3560_v22 }
 0x306   :  { %2904 = vmatprep.subr.bf16.mxu0 %v3562_v44 }
 0x309   :  { %2906 = vmatpush3.bf16.msra.mxu0 %v3562_v44 }
 0x30a   :  { %2908 = vmatprep.subr.bf16.mxu0 %v3564_v53 }
 0x30d   :  { %2910 = vmatpush3.bf16.msra.mxu0 %v3564_v53 }
 0x30e   :  { %2912 = vmatprep.subr.bf16.mxu0 %v3566_v35 }
 0x311   :  { %2914 = vmatpush3.bf16.msra.mxu0 %v3566_v35 }
 0x312   :  { %2916 = vmatprep.subr.bf16.mxu0 %v3362_v50 }
 0x314   :  { %2622 = vmatmul.mubr.f32.vlgmr.msra.gmra.mrb[2].mxu0 %v3573_v8 }
 0x315   :  { %2918 = vmatpush3.bf16.msra.mxu0 %v3362_v50  ;;  %2656 = vmatprep.mubr.f32.mxu0 %v3575_v36 }
 0x316   :  { %2920 = vmatprep.subr.bf16.mxu0 %v3368_v28 }
 0x319   :  { %2922 = vmatpush3.bf16.msra.mxu0 %v3368_v28 }
 0x31a   :  { %2924 = vmatprep.subr.bf16.mxu0 %v3462_v9 }
 0x31d   :  { %2926 = vmatpush3.bf16.msra.mxu0 %v3462_v9  ;;  %v2118_v9 = vld [vmem:[%s3669_s6] ss:$0 sm:$0xff] }
 0x31e   :  { %2928 = vmatprep.subr.bf16.mxu0 %v3472_v54 }
 0x321   :  { %2930 = vmatpush3.bf16.msra.mxu0 %v3472_v54 }
 0x322   :  { %2932 = vmatprep.subr.bf16.mxu0 %v3482_v23 }
 0x325   :  { %2934 = vmatpush3.bf16.msra.mxu0 %v3482_v23 }
 0x326   :  { %2936 = vmatprep.subr.bf16.mxu0 %v3492_v55 }
 0x329   :  { %2938 = vmatpush3.bf16.msra.mxu0 %v3492_v55 }
 0x32a   :  { %2940 = vmatprep.subr.bf16.mxu0 %v3498_v0 }
 0x32d   :  { %2942 = vmatpush3.bf16.msra.mxu0 %v3498_v0 }
 0x32e   :  { %2944 = vmatprep.subr.bf16.mxu0 %v3504_v17 }
 0x331   :  { %2946 = vmatpush3.bf16.msra.mxu0 %v3504_v17 }
 0x334   :  { %2657 = vmatmul.mubr.f32.vlgmr.msra.gmra.mrb[2].mxu0 %v3573_v8 }
 0x3cd   :  { %v2518_v50 = vpop.f32.mrb[2].mxu1 }
 0x3ce   :  { %v1652_v28 = vpop.f32.mrb[3].mxu1  ;;  %v2951_v54 = vadd.f32 %v2518_v50, %v2118_v9 }
 0x3cf   :  { %v2953_v23 = vadd.f32 %v2118_v9, %v1652_v28 }
 0x407   :  { %v2658_v55 = vpop.f32.mrb[2].mxu0 }
 0x408   :  { %v2952_v37 = vadd.f32 %v2951_v54, %v2658_v55  ;;  %v2078_v61 = vpop.f32.mrb[3].mxu0 }
 0x409   :  { %v2954_v0 = vadd.f32 %v2953_v23, %v2078_v61 }
 0x40a   :  { %2089 = vst [vmem:[#allocation7 + $0x8] sm:$0xff] %v2952_v37 }
 0x40b   :  { %2088 = vst [vmem:[#allocation7] sm:$0xff] %v2954_v0 }
 0x40c   :  { %3069 = shalt.err (!%p3066_p6)
}
 0x40d   :  { %s3070_s16 = scalar_lea.hbm %s3670_s7, 256 }
 0x40e   :  { %p3071_p7 = scmp.ne.s32.totalorder %s3670_s7, %s3070_s16  ;;  %p3074_p8 = scmp.lt.u32.totalorder %s3070_s16, %s3670_s7 }
 0x410   :  { %p3076_p9 = pnand %p3074_p8, %p3071_p7 }
 0x412   :  { %3079 = shalt.err (!%p3076_p9)
}
 0x413   :  { %2101 = dma.vmem_to_hbm [thread:$0]  %s2096_s13, 256, %s3670_s7, [#allocation4], %s3087_s11, %s3087_s11, %s3088_s12  }
 0x414   :  { %3084 = dma.done.wait [#allocation4], 256  }
 0x415   :  { %3085 = vsyncadd [#allocation4], 4294967040 }
 0x416   :  { %2105 = vsyncpa [#allocation3], 1 }
 0x417   :  { %2106 = vsyncpa [#allocation6], 1 }
 0x418   :  { %2107 = vsyncpa [#allocation4], 1 }

</bundles_post_ra>
